<compile_context>
chip_gen: v7x
topology: tpu7x:2x2x1
jax: 0.10.0
libtpu: 0.0.40
codegen_flags: <defaults>
</compile_context>

<pallas_src>
import functools

import jax
import jax.numpy as jnp
from jax import lax
from jax.experimental import pallas as pl
from jax.experimental.pallas import tpu as pltpu


def _round_up(x, m):
    return (x + m - 1) // m * m


def _max_tile_rows():
    # v6e / v7x MXU is 2x256^2 -> prefer 256-row tiles; v5e's 4x128^2 saturates at 128.
    try:
        kind = jax.devices()[0].device_kind.lower()
    except Exception:
        kind = ""
    return 128 if "v5" in kind else 256


def _vmem_capacity_bytes():
    try:
        return int(pltpu.get_tpu_info().vmem_capacity_bytes)
    except Exception:
        return 64 << 20            # v7x-safe fallback


def dan_kernel(ids_ref,          # (TB, S)       int32 — VMEM tile
               emb_ref,          # (V_pad, D_pad) bf16 — VMEM, resident
               w1_ref, b1_ref,   # (D_pad, H1) bf16, (1, H1) f32  (1/S folded into W1)
               w2_ref, b2_ref,   # (H1, H2) bf16, (1, H2) f32
               w3_ref, b3_ref,   # (H2, C_pad) bf16, (1, C_pad) f32
               out_ref):         # (TB, C_pad) f32
    tb, seq = ids_ref.shape
    v_pad = emb_ref.shape[0]

    # ---- token-count matrix: counts[b, v] = #{s : ids[b, s] == v} ----------
    # Pure VPU work: S broadcast-compares against a vocab iota, accumulated in f32.
    ids = ids_ref[...]                                          # (TB, S)
    vocab_iota = lax.broadcasted_iota(jnp.int32, (tb, v_pad), 1)
    counts = jnp.zeros((tb, v_pad), jnp.float32)
    for s in range(seq):                                        # trace-time unrolled
        counts = counts + (ids[:, s:s + 1] == vocab_iota).astype(jnp.float32)

    # ---- pooled sequence-sum on the MXU: (TB, V_pad) @ (V_pad, D_pad) ------
    # counts <= S are exactly representable in bf16; the mean's 1/S lives in W1.
    pooled = jnp.dot(counts.astype(emb_ref.dtype), emb_ref[...],
                     preferred_element_type=jnp.float32)        # (TB, D_pad) f32

    # ---- 3-layer MLP; bf16 operands, f32 accumulation -----------------------
    x = pooled.astype(w1_ref.dtype)
    h1 = jnp.dot(x, w1_ref[...], preferred_element_type=jnp.float32) + b1_ref[...]
    h1 = jnp.maximum(h1, 0.0).astype(w2_ref.dtype)
    h2 = jnp.dot(h1, w2_ref[...], preferred_element_type=jnp.float32) + b2_ref[...]
    h2 = jnp.maximum(h2, 0.0).astype(w3_ref.dtype)
    logits = jnp.dot(h2, w3_ref[...], preferred_element_type=jnp.float32) + b3_ref[...]
    out_ref[...] = logits.astype(out_ref.dtype)


@functools.partial(jax.jit, static_argnames=("tb", "matmul_dtype", "emb_dtype"))
def deep_average_network(token_ids, embedding_matrix, params, *,
                         tb=None, matmul_dtype=jnp.bfloat16,
                         emb_dtype=jnp.bfloat16):
    """token_ids: (B, S) int; embedding_matrix: (V, 300) f32; params: 3-layer MLP."""
    batch, seq = token_ids.shape
    vocab, d = embedding_matrix.shape
    w1, b1, w2, b2, w3, b3 = params
    h1_dim, h2_dim, n_classes = w1.shape[1], w2.shape[1], w3.shape[1]

    # ---- batch tile: generation-aware; >=2 grid steps when the batch allows.
    if tb is None:
        max_tb = _max_tile_rows()
        b8 = _round_up(batch, 8)
        if b8 > max_tb:
            tb = max_tb                              # >= 2 tiles automatically
        elif b8 >= 64:
            tb = _round_up((b8 + 1) // 2, 8)         # 2 tiles -> both v7x TCs busy
        else:
            tb = b8                                  # tiny batch: single step
    b_pad = _round_up(batch, tb)

    # ---- lane-dense padding: D 300 -> 384, classes -> 128, vocab -> mult of 128.
    d_pad = _round_up(d, 128)
    v_pad = _round_up(vocab, 128)
    c_pad = _round_up(n_classes, 128)

    emb_p = jnp.pad(embedding_matrix,
                    ((0, v_pad - vocab), (0, d_pad - d))).astype(emb_dtype)
    w1x = jnp.pad(w1 / seq, ((0, d_pad - d), (0, 0))).astype(matmul_dtype)
    w2x = w2.astype(matmul_dtype)
    w3x = jnp.pad(w3, ((0, 0), (0, c_pad - n_classes))).astype(matmul_dtype)
    b3x = jnp.pad(b3, ((0, 0), (0, c_pad - n_classes)))
    ids = jnp.pad(token_ids.astype(jnp.int32), ((0, b_pad - batch), (0, 0)))

    # ---- VMEM budget: x2 for (possibly) double-buffered inputs/outputs, plus
    # in-kernel intermediates and compiler headroom; clamp to 3/4 of capacity
    # (96 MiB on 128-MiB v5e/v6e, 48 MiB on 64-MiB v7x).
    def nbytes(a):
        return a.size * a.dtype.itemsize
    est = (2 * (nbytes(emb_p) + nbytes(w1x) + nbytes(w2x) + nbytes(w3x)
                + nbytes(b1) + nbytes(b2) + nbytes(b3x)
                + tb * seq * 4 + tb * c_pad * 4)
           + 3 * tb * v_pad * 4          # counts / compare temporaries
           + 2 * tb * d_pad * 4          # pooled + bf16 cast
           + (4 << 20))
    vmem_limit = int(min(max(est, 16 << 20), (_vmem_capacity_bytes() * 3) // 4))

    resident = lambda i: (0, 0)          # constant block: never re-fetched

    out = pl.pallas_call(
        dan_kernel,
        out_shape=jax.ShapeDtypeStruct((b_pad, c_pad), jnp.float32),
        grid_spec=pltpu.PrefetchScalarGridSpec(
            num_scalar_prefetch=0,
            grid=(b_pad // tb,),
            in_specs=[
                pl.BlockSpec((tb, seq), lambda i: (i, 0)),        # token ids (VMEM)
                pl.BlockSpec((v_pad, d_pad), resident),           # embedding table
                pl.BlockSpec((d_pad, h1_dim), resident),          # W1 (scaled by 1/S)
                pl.BlockSpec((1, h1_dim), resident),              # b1
                pl.BlockSpec((h1_dim, h2_dim), resident),         # W2
                pl.BlockSpec((1, h2_dim), resident),              # b2
                pl.BlockSpec((h2_dim, c_pad), resident),          # W3 (lane-padded)
                pl.BlockSpec((1, c_pad), resident),               # b3
            ],
            out_specs=pl.BlockSpec((tb, c_pad), lambda i: (i, 0)),
        ),
        compiler_params=pltpu.CompilerParams(
            dimension_semantics=("parallel",),
            vmem_limit_bytes=vmem_limit,
        ),
    )(ids, emb_p, w1x, b1, w2x, b2, w3x, b3x)

    return out[:batch, :n_classes]


def init_params(key, n_classes):
    """PyTorch nn.Linear stores W as (out, in); we keep (in, out) for x @ W."""
    dims = [(300, 256), (256, 128), (128, n_classes)]
    params = []
    for i, (d_in, d_out) in enumerate(dims):
        kw, kb, key = jax.random.split(jax.random.fold_in(key, i), 3)
        bound = 1.0 / jnp.sqrt(d_in)
        w = jax.random.uniform(kw, (d_in, d_out), jnp.float32, -bound, bound)
        # biases kept 2D (1, d_out) so they live cleanly in VMEM and broadcast.
        b = jax.random.uniform(kb, (1, d_out), jnp.float32, -bound, bound)
        params.extend([w, b])
    return tuple(params)


def reference(token_ids, embedding_matrix, params):
    w1, b1, w2, b2, w3, b3 = params
    x = jnp.take(embedding_matrix, token_ids, axis=0).mean(axis=-2)
    x = jnp.maximum(x @ w1 + b1, 0.0)
    x = jnp.maximum(x @ w2 + b2, 0.0)
    return x @ w3 + b3


if __name__ == "__main__":
    key = jax.random.PRNGKey(0)
    k_emb, k_ids, k_params = jax.random.split(key, 3)

    B, S, V, D = 8, 8, 50, 300
    n_classes = 10

    embedding_matrix = jax.random.normal(k_emb, (V, D), jnp.float32)
    token_ids = jax.random.randint(k_ids, (B, S), 0, V, jnp.int32)
    params = init_params(k_params, n_classes)

    out = deep_average_network(token_ids, embedding_matrix, params)
    out = jax.block_until_ready(out)

    ref = jax.block_until_ready(reference(token_ids, embedding_matrix, params))
    assert out.shape == (B, n_classes)
    # bf16 table + bf16 matmul operands (f32 accumulation) => loose-ish tolerance.
    assert jnp.allclose(out, ref, atol=2e-2, rtol=2e-2), "mismatch vs reference"

    print("KERNEL_OK")
</pallas_src>

<mosaic_0001>
module attributes {stable_mosaic.version = 11 : i64} {
  func.func @dan_kernel(%arg0: i32, %arg1: memref<8x8xi32, #tpu.memory_space<vmem>>, %arg2: memref<128x384xbf16, #tpu.memory_space<vmem>>, %arg3: memref<384x256xbf16, #tpu.memory_space<vmem>>, %arg4: memref<1x256xf32, #tpu.memory_space<vmem>>, %arg5: memref<256x128xbf16, #tpu.memory_space<vmem>>, %arg6: memref<1x128xf32, #tpu.memory_space<vmem>>, %arg7: memref<128x128xbf16, #tpu.memory_space<vmem>>, %arg8: memref<1x128xf32, #tpu.memory_space<vmem>>, %arg9: memref<8x128xf32, #tpu.memory_space<vmem>>) attributes {dimension_semantics = [#tpu.dimension_semantics<parallel>], iteration_bounds = array<i64: 1>, scalar_prefetch = 0 : i64, scratch_operands = 0 : i64, tpu.core_type = #tpu.core_type<tc>, window_params = [{transform_indices = @transform_0, window_bounds = array<i64: 8, 8>}, {pipeline_mode = #tpu.pipeline_mode<synchronous>, transform_indices = @transform_1, window_bounds = array<i64: 128, 384>}, {pipeline_mode = #tpu.pipeline_mode<synchronous>, transform_indices = @transform_2, window_bounds = array<i64: 384, 256>}, {pipeline_mode = #tpu.pipeline_mode<synchronous>, transform_indices = @transform_3, window_bounds = array<i64: 1, 256>}, {pipeline_mode = #tpu.pipeline_mode<synchronous>, transform_indices = @transform_4, window_bounds = array<i64: 256, 128>}, {pipeline_mode = #tpu.pipeline_mode<synchronous>, transform_indices = @transform_5, window_bounds = array<i64: 1, 128>}, {pipeline_mode = #tpu.pipeline_mode<synchronous>, transform_indices = @transform_6, window_bounds = array<i64: 128, 128>}, {pipeline_mode = #tpu.pipeline_mode<synchronous>, transform_indices = @transform_7, window_bounds = array<i64: 1, 128>}, {transform_indices = @transform_8, window_bounds = array<i64: 8, 128>}]} {
    %c0 = arith.constant 0 : index
    %c0_0 = arith.constant 0 : index
    %0 = vector.load %arg1[%c0, %c0_0] : memref<8x8xi32, #tpu.memory_space<vmem>>, vector<8x8xi32>
    %1 = tpu.iota {dimensions = array<i32: 1>} : vector<8x128xi32>
    %cst = arith.constant 0.000000e+00 : f32
    %2 = vector.broadcast %cst : f32 to vector<8x128xf32>
    %3 = vector.extract_strided_slice %0 {offsets = [0, 0], sizes = [8, 1], strides = [1, 1]} : vector<8x8xi32> to vector<8x1xi32>
    %4 = vector.broadcast %3 : vector<8x1xi32> to vector<8x128xi32>
    %5 = arith.cmpi eq, %4, %1 : vector<8x128xi32>
    %6 = arith.extui %5 : vector<8x128xi1> to vector<8x128xi32>
    %7 = arith.sitofp %6 : vector<8x128xi32> to vector<8x128xf32>
    %8 = arith.addf %2, %7 : vector<8x128xf32>
    %9 = vector.extract_strided_slice %0 {offsets = [0, 1], sizes = [8, 1], strides = [1, 1]} : vector<8x8xi32> to vector<8x1xi32>
    %10 = vector.broadcast %9 : vector<8x1xi32> to vector<8x128xi32>
    %11 = arith.cmpi eq, %10, %1 : vector<8x128xi32>
    %12 = arith.extui %11 : vector<8x128xi1> to vector<8x128xi32>
    %13 = arith.sitofp %12 : vector<8x128xi32> to vector<8x128xf32>
    %14 = arith.addf %8, %13 : vector<8x128xf32>
    %15 = vector.extract_strided_slice %0 {offsets = [0, 2], sizes = [8, 1], strides = [1, 1]} : vector<8x8xi32> to vector<8x1xi32>
    %16 = vector.broadcast %15 : vector<8x1xi32> to vector<8x128xi32>
    %17 = arith.cmpi eq, %16, %1 : vector<8x128xi32>
    %18 = arith.extui %17 : vector<8x128xi1> to vector<8x128xi32>
    %19 = arith.sitofp %18 : vector<8x128xi32> to vector<8x128xf32>
    %20 = arith.addf %14, %19 : vector<8x128xf32>
    %21 = vector.extract_strided_slice %0 {offsets = [0, 3], sizes = [8, 1], strides = [1, 1]} : vector<8x8xi32> to vector<8x1xi32>
    %22 = vector.broadcast %21 : vector<8x1xi32> to vector<8x128xi32>
    %23 = arith.cmpi eq, %22, %1 : vector<8x128xi32>
    %24 = arith.extui %23 : vector<8x128xi1> to vector<8x128xi32>
    %25 = arith.sitofp %24 : vector<8x128xi32> to vector<8x128xf32>
    %26 = arith.addf %20, %25 : vector<8x128xf32>
    %27 = vector.extract_strided_slice %0 {offsets = [0, 4], sizes = [8, 1], strides = [1, 1]} : vector<8x8xi32> to vector<8x1xi32>
    %28 = vector.broadcast %27 : vector<8x1xi32> to vector<8x128xi32>
    %29 = arith.cmpi eq, %28, %1 : vector<8x128xi32>
    %30 = arith.extui %29 : vector<8x128xi1> to vector<8x128xi32>
    %31 = arith.sitofp %30 : vector<8x128xi32> to vector<8x128xf32>
    %32 = arith.addf %26, %31 : vector<8x128xf32>
    %33 = vector.extract_strided_slice %0 {offsets = [0, 5], sizes = [8, 1], strides = [1, 1]} : vector<8x8xi32> to vector<8x1xi32>
    %34 = vector.broadcast %33 : vector<8x1xi32> to vector<8x128xi32>
    %35 = arith.cmpi eq, %34, %1 : vector<8x128xi32>
    %36 = arith.extui %35 : vector<8x128xi1> to vector<8x128xi32>
    %37 = arith.sitofp %36 : vector<8x128xi32> to vector<8x128xf32>
    %38 = arith.addf %32, %37 : vector<8x128xf32>
    %39 = vector.extract_strided_slice %0 {offsets = [0, 6], sizes = [8, 1], strides = [1, 1]} : vector<8x8xi32> to vector<8x1xi32>
    %40 = vector.broadcast %39 : vector<8x1xi32> to vector<8x128xi32>
    %41 = arith.cmpi eq, %40, %1 : vector<8x128xi32>
    %42 = arith.extui %41 : vector<8x128xi1> to vector<8x128xi32>
    %43 = arith.sitofp %42 : vector<8x128xi32> to vector<8x128xf32>
    %44 = arith.addf %38, %43 : vector<8x128xf32>
    %45 = vector.extract_strided_slice %0 {offsets = [0, 7], sizes = [8, 1], strides = [1, 1]} : vector<8x8xi32> to vector<8x1xi32>
    %46 = vector.broadcast %45 : vector<8x1xi32> to vector<8x128xi32>
    %47 = arith.cmpi eq, %46, %1 : vector<8x128xi32>
    %48 = arith.extui %47 : vector<8x128xi1> to vector<8x128xi32>
    %49 = arith.sitofp %48 : vector<8x128xi32> to vector<8x128xf32>
    %50 = arith.addf %44, %49 : vector<8x128xf32>
    %51 = arith.truncf %50 : vector<8x128xf32> to vector<8x128xbf16>
    %c0_1 = arith.constant 0 : index
    %c0_2 = arith.constant 0 : index
    %52 = vector.load %arg2[%c0_1, %c0_2] : memref<128x384xbf16, #tpu.memory_space<vmem>>, vector<128x384xbf16>
    %cst_3 = arith.constant dense<0.000000e+00> : vector<8x384xf32>
    %53 = tpu.matmul %51, %52, %cst_3 {dimension_numbers = #tpu.dot_dimension_numbers<[1], [0], [0], [1], [0, 0, 1, 1], [], []>} : vector<8x128xbf16>, vector<128x384xbf16>, vector<8x384xf32> -> vector<8x384xf32>
    %54 = arith.truncf %53 : vector<8x384xf32> to vector<8x384xbf16>
    %c0_4 = arith.constant 0 : index
    %c0_5 = arith.constant 0 : index
    %55 = vector.load %arg3[%c0_4, %c0_5] : memref<384x256xbf16, #tpu.memory_space<vmem>>, vector<384x256xbf16>
    %cst_6 = arith.constant dense<0.000000e+00> : vector<8x256xf32>
    %56 = tpu.matmul %54, %55, %cst_6 {dimension_numbers = #tpu.dot_dimension_numbers<[1], [0], [0], [1], [0, 0, 1, 1], [], []>} : vector<8x384xbf16>, vector<384x256xbf16>, vector<8x256xf32> -> vector<8x256xf32>
    %c0_7 = arith.constant 0 : index
    %c0_8 = arith.constant 0 : index
    %57 = vector.load %arg4[%c0_7, %c0_8] : memref<1x256xf32, #tpu.memory_space<vmem>>, vector<1x256xf32>
    %58 = vector.broadcast %57 : vector<1x256xf32> to vector<8x256xf32>
    %59 = arith.addf %56, %58 : vector<8x256xf32>
    %cst_9 = arith.constant 0.000000e+00 : f32
    %60 = vector.broadcast %cst_9 : f32 to vector<8x256xf32>
    %61 = arith.maximumf %59, %60 : vector<8x256xf32>
    %62 = arith.truncf %61 : vector<8x256xf32> to vector<8x256xbf16>
    %c0_10 = arith.constant 0 : index
    %c0_11 = arith.constant 0 : index
    %63 = vector.load %arg5[%c0_10, %c0_11] : memref<256x128xbf16, #tpu.memory_space<vmem>>, vector<256x128xbf16>
    %cst_12 = arith.constant dense<0.000000e+00> : vector<8x128xf32>
    %64 = tpu.matmul %62, %63, %cst_12 {dimension_numbers = #tpu.dot_dimension_numbers<[1], [0], [0], [1], [0, 0, 1, 1], [], []>} : vector<8x256xbf16>, vector<256x128xbf16>, vector<8x128xf32> -> vector<8x128xf32>
    %c0_13 = arith.constant 0 : index
    %c0_14 = arith.constant 0 : index
    %65 = vector.load %arg6[%c0_13, %c0_14] : memref<1x128xf32, #tpu.memory_space<vmem>>, vector<1x128xf32>
    %66 = vector.broadcast %65 : vector<1x128xf32> to vector<8x128xf32>
    %67 = arith.addf %64, %66 : vector<8x128xf32>
    %cst_15 = arith.constant 0.000000e+00 : f32
    %68 = vector.broadcast %cst_15 : f32 to vector<8x128xf32>
    %69 = arith.maximumf %67, %68 : vector<8x128xf32>
    %70 = arith.truncf %69 : vector<8x128xf32> to vector<8x128xbf16>
    %c0_16 = arith.constant 0 : index
    %c0_17 = arith.constant 0 : index
    %71 = vector.load %arg7[%c0_16, %c0_17] : memref<128x128xbf16, #tpu.memory_space<vmem>>, vector<128x128xbf16>
    %cst_18 = arith.constant dense<0.000000e+00> : vector<8x128xf32>
    %72 = tpu.matmul %70, %71, %cst_18 {dimension_numbers = #tpu.dot_dimension_numbers<[1], [0], [0], [1], [0, 0, 1, 1], [], []>} : vector<8x128xbf16>, vector<128x128xbf16>, vector<8x128xf32> -> vector<8x128xf32>
    %c0_19 = arith.constant 0 : index
    %c0_20 = arith.constant 0 : index
    %73 = vector.load %arg8[%c0_19, %c0_20] : memref<1x128xf32, #tpu.memory_space<vmem>>, vector<1x128xf32>
    %74 = vector.broadcast %73 : vector<1x128xf32> to vector<8x128xf32>
    %75 = arith.addf %72, %74 : vector<8x128xf32>
    %c0_21 = arith.constant 0 : index
    %c0_22 = arith.constant 0 : index
    %76 = vector.load %arg9[%c0_21, %c0_22] : memref<8x128xf32, #tpu.memory_space<vmem>>, vector<8x128xf32>
    tpu.vector_store %arg9[%c0_21, %c0_22], %75 {strides = array<i32>} : memref<8x128xf32, #tpu.memory_space<vmem>>, vector<8x128xf32>,
    return
  }
  func.func @transform_0(%arg0: i32) -> (i32, i32) {
    %c0_i32 = arith.constant 0 : i32
    %c0_i32_0 = arith.constant 0 : i32
    return %arg0, %c0_i32 : i32, i32
  }
  func.func @transform_1(%arg0: i32) -> (i32, i32) {
    %c0_i32 = arith.constant 0 : i32
    %c0_i32_0 = arith.constant 0 : i32
    %c0_i32_1 = arith.constant 0 : i32
    return %c0_i32, %c0_i32_0 : i32, i32
  }
  func.func @transform_2(%arg0: i32) -> (i32, i32) {
    %c0_i32 = arith.constant 0 : i32
    %c0_i32_0 = arith.constant 0 : i32
    %c0_i32_1 = arith.constant 0 : i32
    return %c0_i32, %c0_i32_0 : i32, i32
  }
  func.func @transform_3(%arg0: i32) -> (i32, i32) {
    %c0_i32 = arith.constant 0 : i32
    %c0_i32_0 = arith.constant 0 : i32
    %c0_i32_1 = arith.constant 0 : i32
    return %c0_i32, %c0_i32_0 : i32, i32
  }
  func.func @transform_4(%arg0: i32) -> (i32, i32) {
    %c0_i32 = arith.constant 0 : i32
    %c0_i32_0 = arith.constant 0 : i32
    %c0_i32_1 = arith.constant 0 : i32
    return %c0_i32, %c0_i32_0 : i32, i32
  }
  func.func @transform_5(%arg0: i32) -> (i32, i32) {
    %c0_i32 = arith.constant 0 : i32
    %c0_i32_0 = arith.constant 0 : i32
    %c0_i32_1 = arith.constant 0 : i32
    return %c0_i32, %c0_i32_0 : i32, i32
  }
  func.func @transform_6(%arg0: i32) -> (i32, i32) {
    %c0_i32 = arith.constant 0 : i32
    %c0_i32_0 = arith.constant 0 : i32
    %c0_i32_1 = arith.constant 0 : i32
    return %c0_i32, %c0_i32_0 : i32, i32
  }
  func.func @transform_7(%arg0: i32) -> (i32, i32) {
    %c0_i32 = arith.constant 0 : i32
    %c0_i32_0 = arith.constant 0 : i32
    %c0_i32_1 = arith.constant 0 : i32
    return %c0_i32, %c0_i32_0 : i32, i32
  }
  func.func @transform_8(%arg0: i32) -> (i32, i32) {
    %c0_i32 = arith.constant 0 : i32
    %c0_i32_0 = arith.constant 0 : i32
    return %arg0, %c0_i32 : i32, i32
  }
}

</mosaic_0001>

<bundles_post_ra>
// kernel: deep_average_network.1
= control target key start
LH: loop header
LB: loop body
LE: loop exit
PB: predicated region body
PF: predicated region fallthrough
CT: control target
= control target key end

     0   :  { %v1388_v1 = vmov 2   ;;  %v1389_v2 = vmov 0   ;;  %v1390_v5 = vmov 0.0   ;;  %v1391_v10 = vmov 3   ;;  %s1799_s0 = inlined_call_operand.vmem [shape: s32[8,8], index: 0, kind: input, shape index: {}]   ;;  %s1800_s1 = inlined_call_operand.vmem [shape: bf16[128,384], index: 1, kind: input, shape index: {}]   ;;  %s1801_s2 = inlined_call_operand.vmem [shape: bf16[384,256], index: 2, kind: input, shape index: {}]   ;;  %s1802_s3 = inlined_call_operand.vmem [shape: f32[1,256], index: 3, kind: input, shape index: {}]   ;;  %s1803_s4 = inlined_call_operand.vmem [shape: bf16[256,128], index: 4, kind: input, shape index: {}]   ;;  %s1804_s5 = inlined_call_operand.vmem [shape: f32[1,128], index: 5, kind: input, shape index: {}]   ;;  %s1805_s6 = inlined_call_operand.vmem [shape: bf16[128,128], index: 6, kind: input, shape index: {}]   ;;  %s1806_s7 = inlined_call_operand.vmem [shape: f32[1,128], index: 7, kind: input, shape index: {}]   ;;  %s1807_s8 = inlined_call_operand.hbm [shape: f32[8,128], index: 8, kind: output, shape index: {}]  }
   0x1   :  { %v1447_v0 = vld [vmem:[%s1799_s0] sm:$0xff]  ;;  %1229 = vset.pattern.permute.xlu1 %v1388_v1  ;;  %1227 = vset.pattern.permute.xlu0 %v1389_v2  ;;  %v1239_v6 = vld [vmem:[%s1800_s1 + $0x8] ss:$12 sps:$4 sm:$0xff]   ;;  %v1392_v11 = vmov 1   ;;  %v1246_v13 = vld [vmem:[%s1800_s1 + $0x30] ss:$12 sps:$4 sm:$0xff]  }
   0x2   :  { %49 = vperm.xlu1 %1229, %v1447_v0   ;;  %35 = vperm.xlu0 %1227, %v1447_v0   ;;  %v1236_v3 = vld [vmem:[%s1800_s1 + $0x4] ss:$12 sps:$4 sm:$0xff]   ;;  %v1238_v4 = vld [vmem:[%s1800_s1] ss:$12 sps:$4 sm:$0xff]   ;;  %v1240_v7 = vld [vmem:[%s1800_s1 + $0x1c] ss:$12 sps:$4 sm:$0xff]  }
   0x3   :  { %1170 = vmatprep.subr.bf16.mxu1 %v1390_v5  ;;  %283 = vmatprep.mubr.bf16.mxu0 %v1389_v2  ;;  %v1242_v8 = vld [vmem:[%s1800_s1 + $0x18] ss:$12 sps:$4 sm:$0xff]   ;;  %v1243_v9 = vld [vmem:[%s1800_s1 + $0x20] ss:$12 sps:$4 sm:$0xff]   ;;  %v1393_v16 = vmov 4   ;;  %v1394_v17 = vmov 5  }
   0x4   :  { %251 = vmatprep.subr.bf16.mxu0 %v1236_v3  ;;  %1171 = vmatpush3.bf16.msra.mxu1 %v1239_v6  ;;  %v1244_v12 = vld [vmem:[%s1800_s1 + $0x34] ss:$12 sps:$4 sm:$0xff]   ;;  %v1247_v14 = vld [vmem:[%s1800_s1 + $0x38] ss:$12 sps:$4 sm:$0xff]   ;;  %v1251_v19 = vld [vmem:[%s1800_s1 + $0x50] ss:$12 sps:$4 sm:$0xff]  }
   0x5   :  { %252 = vmatpush1.bf16.msra.mxu0 %v1238_v4  ;;  %1172 = vmatprep.subr.bf16.mxu1 %v1390_v5  ;;  %v1248_v15 = vld [vmem:[%s1800_s1 + $0x4c] ss:$12 sps:$4 sm:$0xff]   ;;  %v1250_v18 = vld [vmem:[%s1800_s1 + $0x48] ss:$12 sps:$4 sm:$0xff]   ;;  %v1252_v20 = vld [vmem:[%s1800_s1 + $0x64] ss:$12 sps:$4 sm:$0xff]  }
   0x6   :  { %1230 = vset.pattern.permute.xlu1 %v1391_v10  ;;  %1228 = vset.pattern.permute.xlu0 %v1392_v11  ;;  %v1254_v21 = vld [vmem:[%s1800_s1 + $0x60] ss:$12 sps:$4 sm:$0xff]   ;;  %v1395_v22 = vmov 6   ;;  %v1396_v23 = vmov 7   ;;  %v1255_v24 = vld [vmem:[%s1800_s1 + $0x68] ss:$12 sps:$4 sm:$0xff]  }
   0x7   :  { %56 = vperm.xlu1 %1230, %v1447_v0   ;;  %42 = vperm.xlu0 %1228, %v1447_v0   ;;  %v1256_v25 = vld [vmem:[%s1800_s1 + $0x7c] ss:$12 sps:$4 sm:$0xff]   ;;  %v1258_v26 = vld [vmem:[%s1800_s1 + $0x78] ss:$12 sps:$4 sm:$0xff]   ;;  %v1259_v27 = vld [vmem:[%s1800_s1 + $0x80] ss:$12 sps:$4 sm:$0xff]  }
   0x8   :  { %253 = vmatprep.subr.bf16.mxu0 %v1240_v7  ;;  %1173 = vmatpush3.bf16.msra.mxu1 %v1243_v9  ;;  %v1260_v28 = vld [vmem:[%s1800_s1 + $0x94] ss:$12 sps:$4 sm:$0xff]   ;;  %v1262_v29 = vld [vmem:[%s1800_s1 + $0x90] ss:$12 sps:$4 sm:$0xff]   ;;  %v1263_v30 = vld [vmem:[%s1800_s1 + $0x98] ss:$12 sps:$4 sm:$0xff]  }
   0x9   :  { %254 = vmatpush1.bf16.msra.mxu0 %v1242_v8  ;;  %1174 = vmatprep.subr.bf16.mxu1 %v1390_v5  ;;  %v1264_v31 = vld [vmem:[%s1800_s1 + $0xac] ss:$12 sps:$4 sm:$0xff]   ;;  %vm1397_vm0 = vmmov 0   ;;  %v1266_v32 = vld [vmem:[%s1800_s1 + $0xa8] ss:$12 sps:$4 sm:$0xff]  }
   0xa   :  { %255 = vmatprep.subr.bf16.mxu0 %v1244_v12  ;;  %1186 = vmatprep.mubr.msk.bf16.mxu1 %vm1397_vm0, %v1390_v5  ;;  %v1267_v33 = vld [vmem:[%s1800_s1 + $0xb0] ss:$12 sps:$4 sm:$0xff]   ;;  %v1270_v34 = vld [vmem:[%s1801_s2 + $0x4] ss:$8 sps:$4 sm:$0xff]  }
   0xb   :  { %1231 = vset.pattern.permute.xlu1 %v1393_v16  ;;  %1232 = vset.pattern.permute.xlu0 %v1394_v17 }
   0xc   :  { %63 = vperm.xlu1 %1231, %v1447_v0   ;;  %70 = vperm.xlu0 %1232, %v1447_v0  }
   0xd   :  { %256 = vmatpush1.bf16.msra.mxu0 %v1246_v13  ;;  %1175 = vmatpush3.bf16.msra.mxu1 %v1247_v14 }
   0xe   :  { %257 = vmatprep.subr.bf16.mxu0 %v1248_v15  ;;  %1176 = vmatprep.subr.bf16.mxu1 %v1390_v5 }
  0x10   :  { %1233 = vset.pattern.permute.xlu1 %v1395_v22  ;;  %1235 = vset.pattern.permute.xlu0 %v1396_v23 }
  0x11   :  { %77 = vperm.xlu1 %1233, %v1447_v0   ;;  %258 = vmatpush1.bf16.msra.mxu0 %v1250_v18 }
  0x12   :  { %1177 = vmatpush3.bf16.msra.mxu1 %v1251_v19  ;;  %259 = vmatprep.subr.bf16.mxu0 %v1252_v20 }
  0x13   :  { %1178 = vmatprep.subr.bf16.mxu1 %v1390_v5 }
  0x15   :  { %1234 = vset.pattern.permute.xlu1 %v1396_v23  ;;  %260 = vmatpush1.bf16.msra.mxu0 %v1254_v21 }
  0x16   :  { %84 = vperm.xlu1 %1234, %v1447_v0   ;;  %1179 = vmatpush3.bf16.msra.mxu1 %v1255_v24 }
  0x17   :  { %261 = vmatprep.subr.bf16.mxu0 %v1256_v25  ;;  %1180 = vmatprep.subr.bf16.mxu1 %v1390_v5 }
  0x19   :  { %262 = vmatpush1.bf16.msra.mxu0 %v1258_v26 }
  0x1a   :  { %1181 = vmatpush3.bf16.msra.mxu1 %v1259_v27  ;;  %263 = vmatprep.subr.bf16.mxu0 %v1260_v28 }
  0x1b   :  { %1182 = vmatprep.subr.bf16.mxu1 %v1390_v5 }
  0x1d   :  { %264 = vmatpush1.bf16.msra.mxu0 %v1262_v29 }
  0x1e   :  { %1183 = vmatpush3.bf16.msra.mxu1 %v1263_v30  ;;  %265 = vmatprep.subr.bf16.mxu0 %v1264_v31 }
  0x1f   :  { %1184 = vmatprep.subr.bf16.mxu1 %v1390_v5 }
  0x21   :  { %266 = vmatpush1.bf16.msra.mxu0 %v1266_v32 }
  0x22   :  { %1185 = vmatpush3.bf16.msra.mxu1 %v1267_v33  ;;  %635 = vmatprep.subr.bf16.mxu0 %v1270_v34 }
  0x23   :  { %13 = vsyncpa [#allocation3], 0  ;;  %v32_v35 = vlaneseq  ;;  %v1268_v60 = vld [vmem:[%s1801_s2] ss:$8 sps:$4 sm:$0xff]   ;;  %v1273_v62 = vld [vmem:[%s1801_s2 + $0x14] ss:$8 sps:$4 sm:$0xff]  }
  0x24   :  { %v1271_v63 = vld [vmem:[%s1801_s2 + $0x10] ss:$8 sps:$4 sm:$0xff]   ;;  %v1276_v0 = vld [vmem:[%s1801_s2 + $0x24] ss:$8 sps:$4 sm:$0xff]   ;;  %v1274_v1 = vld [vmem:[%s1801_s2 + $0x20] ss:$8 sps:$4 sm:$0xff]  }
  0x25   :  { %v33_v38 = vand.u32 127, %v32_v35  ;;  %v1279_v3 = vld [vmem:[%s1801_s2 + $0x34] ss:$8 sps:$4 sm:$0xff]   ;;  %v1277_v4 = vld [vmem:[%s1801_s2 + $0x30] ss:$8 sps:$4 sm:$0xff]   ;;  %v1340_v31 = vld [vmem:[%s1803_s4 + $0x40] sm:$0xff]  }
  0x26   :  { %v1282_v6 = vld [vmem:[%s1801_s2 + $0x44] ss:$8 sps:$4 sm:$0xff]   ;;  %v1280_v7 = vld [vmem:[%s1801_s2 + $0x40] ss:$8 sps:$4 sm:$0xff]   ;;  %v1285_v8 = vld [vmem:[%s1801_s2 + $0x54] ss:$8 sps:$4 sm:$0xff]   ;;  %1139 = vmatprep.subr.bf16.mxu1 %v1340_v31 }
  0x27   :  { %v1283_v9 = vld [vmem:[%s1801_s2 + $0x50] ss:$8 sps:$4 sm:$0xff]   ;;  %v1288_v10 = vld [vmem:[%s1801_s2 + $0x64] ss:$8 sps:$4 sm:$0xff]   ;;  %v1286_v11 = vld [vmem:[%s1801_s2 + $0x60] ss:$8 sps:$4 sm:$0xff]  }
  0x28   :  { %v1291_v12 = vld [vmem:[%s1801_s2 + $0x74] ss:$8 sps:$4 sm:$0xff]   ;;  %v1289_v13 = vld [vmem:[%s1801_s2 + $0x70] ss:$8 sps:$4 sm:$0xff]   ;;  %v1294_v14 = vld [vmem:[%s1801_s2 + $0x84] ss:$8 sps:$4 sm:$0xff]  }
  0x29   :  { %v1292_v15 = vld [vmem:[%s1801_s2 + $0x80] ss:$8 sps:$4 sm:$0xff]   ;;  %v1297_v16 = vld [vmem:[%s1801_s2 + $0x94] ss:$8 sps:$4 sm:$0xff]   ;;  %v1295_v17 = vld [vmem:[%s1801_s2 + $0x90] ss:$8 sps:$4 sm:$0xff]  }
  0x2a   :  { %v1300_v18 = vld [vmem:[%s1801_s2 + $0xa4] ss:$8 sps:$4 sm:$0xff]   ;;  %v1298_v19 = vld [vmem:[%s1801_s2 + $0xa0] ss:$8 sps:$4 sm:$0xff]   ;;  %v1303_v20 = vld [vmem:[%s1801_s2 + $0xb4] ss:$8 sps:$4 sm:$0xff]  }
  0x2b   :  { %v1301_v21 = vld [vmem:[%s1801_s2 + $0xb0] ss:$8 sps:$4 sm:$0xff]   ;;  %v1306_v22 = vld [vmem:[%s1801_s2 + $0xc4] ss:$8 sps:$4 sm:$0xff]   ;;  %v1304_v23 = vld [vmem:[%s1801_s2 + $0xc0] ss:$8 sps:$4 sm:$0xff]  }
  0x2c   :  { %v1309_v24 = vld [vmem:[%s1801_s2 + $0xd4] ss:$8 sps:$4 sm:$0xff]   ;;  %v1307_v25 = vld [vmem:[%s1801_s2 + $0xd0] ss:$8 sps:$4 sm:$0xff]   ;;  %v1312_v26 = vld [vmem:[%s1801_s2 + $0xe4] ss:$8 sps:$4 sm:$0xff]  }
  0x2d   :  { %v1310_v27 = vld [vmem:[%s1801_s2 + $0xe0] ss:$8 sps:$4 sm:$0xff]   ;;  %v1315_v28 = vld [vmem:[%s1801_s2 + $0xf4] ss:$8 sps:$4 sm:$0xff]   ;;  %v1313_v29 = vld [vmem:[%s1801_s2 + $0xf0] ss:$8 sps:$4 sm:$0xff]  }
  0x2e   :  { %v1318_v30 = vld [vmem:[%s1801_s2 + $0x104] ss:$8 sps:$4 sm:$0xff]   ;;  %s1398_s0 = smov [#allocation2]  }
  0x2f   :  { %v1341_v32 = vld [vmem:[%s1803_s4] sm:$0xff]   ;;  %v1342_v33 = vld [vmem:[%s1803_s4 + $0x48] sm:$0xff]  }
  0x30   :  { %v1343_v34 = vld [vmem:[%s1803_s4 + $0x8] sm:$0xff]  }
  0x31   :  { %v1361_v31 = vld [vmem:[%s1805_s6 + $0x28] sm:$0xff]  }
  0x81   :  { %v50_v36 = vpop.permute.xlu1 %49  ;;  %v36_v37 = vpop.permute.xlu0 %35 }
  0x82   :  { %vm37_vm1 = vcmp.eq.s32.totalorder %v36_v37, %v33_v38  ;;  %vm51_vm2 = vcmp.eq.s32.totalorder %v50_v36, %v33_v38  ;;  %v1344_v36 = vld [vmem:[%s1803_s4 + $0x50] sm:$0xff]  }
  0x83   :  { %v1024_v41 = vsel %vm37_vm1, 1.0, %v1390_v5  ;;  %v1026_v44 = vsel %vm51_vm2, 1.0, %v1390_v5  ;;  %v1345_v37 = vld [vmem:[%s1803_s4 + $0x10] sm:$0xff]  }
  0x86   :  { %v57_v39 = vpop.permute.xlu1 %56  ;;  %v43_v40 = vpop.permute.xlu0 %42 }
  0x87   :  { %vm44_vm3 = vcmp.eq.s32.totalorder %v43_v40, %v33_v38  ;;  %vm58_vm4 = vcmp.eq.s32.totalorder %v57_v39, %v33_v38  ;;  %v1347_v39 = vld [vmem:[%s1803_s4 + $0x18] sm:$0xff]   ;;  %v1348_v40 = vld [vmem:[%s1803_s4 + $0x60] sm:$0xff]  }
  0x88   :  { %v1025_v42 = vsel %vm44_vm3, 1.0, %v1390_v5  ;;  %v1027_v48 = vsel %vm58_vm4, 1.0, %v1390_v5 }
  0x89   :  { %v47_v43 = vadd.f32 %v1025_v42, %v1024_v41  ;;  %v1349_v41 = vld [vmem:[%s1803_s4 + $0x20] sm:$0xff]   ;;  %v1350_v42 = vld [vmem:[%s1803_s4 + $0x68] sm:$0xff]  }
  0x8b   :  { %v54_v45 = vadd.f32 %v1026_v44, %v47_v43  ;;  %v64_v46 = vpop.permute.xlu1 %63  ;;  %v71_v47 = vpop.permute.xlu0 %70  ;;  %v1351_v43 = vld [vmem:[%s1803_s4 + $0x28] sm:$0xff]  }
  0x8c   :  { %vm65_vm5 = vcmp.eq.s32.totalorder %v64_v46, %v33_v38  ;;  %vm72_vm6 = vcmp.eq.s32.totalorder %v71_v47, %v33_v38 }
  0x8d   :  { %v61_v49 = vadd.f32 %v1027_v48, %v54_v45  ;;  %v1028_v50 = vsel %vm65_vm5, 1.0, %v1390_v5  ;;  %v1029_v52 = vsel %vm72_vm6, 1.0, %v1390_v5 }
  0x8f   :  { %v68_v51 = vadd.f32 %v1028_v50, %v61_v49 }
  0x90   :  { %v78_v53 = vpop.permute.xlu1 %77 }
  0x91   :  { %vm79_vm7 = vcmp.eq.s32.totalorder %v78_v53, %v33_v38  ;;  %v75_v54 = vadd.f32 %v1029_v52, %v68_v51  ;;  %v1316_v51 = vld [vmem:[%s1801_s2 + $0x100] ss:$8 sps:$4 sm:$0xff]  }
  0x92   :  { %v1030_v55 = vsel %vm79_vm7, 1.0, %v1390_v5 }
  0x93   :  { %v82_v57 = vadd.f32 %v1030_v55, %v75_v54  ;;  %v1321_v55 = vld [vmem:[%s1801_s2 + $0x114] ss:$8 sps:$4 sm:$0xff]  }
  0x95   :  { %v85_v56 = vpop.permute.xlu1 %84 }
  0x96   :  { %vm86_vm8 = vcmp.eq.s32.totalorder %v85_v56, %v33_v38  ;;  %v1346_v38 = vld [vmem:[%s1803_s4 + $0x58] sm:$0xff]  }
  0x97   :  { %v1031_v58 = vsel %vm86_vm8, 1.0, %v1390_v5  ;;  %v1319_v56 = vld [vmem:[%s1801_s2 + $0x110] ss:$8 sps:$4 sm:$0xff]  }
  0x98   :  { %v89_v59 = vadd.f32 %v1031_v58, %v82_v57  ;;  %v1324_v57 = vld [vmem:[%s1801_s2 + $0x124] ss:$8 sps:$4 sm:$0xff]   ;;  %v1322_v58 = vld [vmem:[%s1801_s2 + $0x120] ss:$8 sps:$4 sm:$0xff]  }
  0x9a   :  { %v90_v61 = vpack.c.bf16 %v89_v59, %v89_v59  ;;  %v1327_v59 = vld [vmem:[%s1801_s2 + $0x134] ss:$8 sps:$4 sm:$0xff]  }
  0x9c   :  { %284 = vmatmul.mubr.bf16.vlgmr.msra.gmra.mrb[0].mxu0 %v90_v61  ;;  %1187 = vmatmul.mubr.bf16.vlgmr.msra.gmra.mrb[0].mxu1 %v90_v61  ;;  %v1328_v61 = vld [vmem:[%s1801_s2 + $0x140] ss:$8 sps:$4 sm:$0xff]  }
  0x9d   :  { %636 = vmatpush1.bf16.msra.mxu0 %v1268_v60  ;;  %1140 = vmatpush3.bf16.msra.mxu1 %v1341_v32  ;;  %v1330_v60 = vld [vmem:[%s1801_s2 + $0x144] ss:$8 sps:$4 sm:$0xff]   ;;  %v1362_v32 = vld [vmem:[%s1805_s6 + $0x30] sm:$0xff]  }
  0x9e   :  { %637 = vmatprep.subr.bf16.mxu0 %v1273_v62  ;;  %1141 = vmatprep.subr.bf16.mxu1 %v1342_v33  ;;  %v1333_v62 = vld [vmem:[%s1801_s2 + $0x154] ss:$8 sps:$4 sm:$0xff]  }
  0x9f   :  { %v1363_v33 = vld [vmem:[%s1805_s6 + $0x38] sm:$0xff]  }
  0xa1   :  { %638 = vmatpush1.bf16.msra.mxu0 %v1271_v63  ;;  %1142 = vmatpush3.bf16.msra.mxu1 %v1343_v34  ;;  %v1331_v63 = vld [vmem:[%s1801_s2 + $0x150] ss:$8 sps:$4 sm:$0xff]  }
  0xa2   :  { %639 = vmatprep.subr.bf16.mxu0 %v1276_v0  ;;  %1143 = vmatprep.subr.bf16.mxu1 %v1344_v36  ;;  %v1336_v0 = vld [vmem:[%s1801_s2 + $0x164] ss:$8 sps:$4 sm:$0xff]   ;;  %v1104_v36 = vld [vmem:[%s1804_s5] ss:$0 sm:$0xff] }
  0xa5   :  { %640 = vmatpush1.bf16.msra.mxu0 %v1274_v1  ;;  %1144 = vmatpush3.bf16.msra.mxu1 %v1345_v37  ;;  %v1334_v1 = vld [vmem:[%s1801_s2 + $0x160] ss:$8 sps:$4 sm:$0xff]  }
  0xa6   :  { %641 = vmatprep.subr.bf16.mxu0 %v1279_v3  ;;  %1145 = vmatprep.subr.bf16.mxu1 %v1346_v38  ;;  %v1339_v3 = vld [vmem:[%s1801_s2 + $0x174] ss:$8 sps:$4 sm:$0xff]  }
  0xa9   :  { %642 = vmatpush1.bf16.msra.mxu0 %v1277_v4  ;;  %1146 = vmatpush3.bf16.msra.mxu1 %v1347_v39  ;;  %v1337_v4 = vld [vmem:[%s1801_s2 + $0x170] ss:$8 sps:$4 sm:$0xff]  }
  0xaa   :  { %643 = vmatprep.subr.bf16.mxu0 %v1282_v6  ;;  %1147 = vmatprep.subr.bf16.mxu1 %v1348_v40 }
  0xad   :  { %644 = vmatpush1.bf16.msra.mxu0 %v1280_v7  ;;  %1148 = vmatpush3.bf16.msra.mxu1 %v1349_v41  ;;  %v1352_v7 = vld [vmem:[%s1803_s4 + $0x70] sm:$0xff]  }
  0xae   :  { %645 = vmatprep.subr.bf16.mxu0 %v1285_v8  ;;  %1149 = vmatprep.subr.bf16.mxu1 %v1350_v42  ;;  %v1353_v8 = vld [vmem:[%s1803_s4 + $0x30] sm:$0xff]  }
  0xb1   :  { %646 = vmatpush1.bf16.msra.mxu0 %v1283_v9  ;;  %1150 = vmatpush3.bf16.msra.mxu1 %v1351_v43  ;;  %v1354_v9 = vld [vmem:[%s1803_s4 + $0x78] sm:$0xff]  }
  0xb2   :  { %647 = vmatprep.subr.bf16.mxu0 %v1288_v10  ;;  %1151 = vmatprep.subr.bf16.mxu1 %v1352_v7  ;;  %v1355_v10 = vld [vmem:[%s1803_s4 + $0x38] sm:$0xff]  }
  0xb5   :  { %648 = vmatpush1.bf16.msra.mxu0 %v1286_v11  ;;  %1152 = vmatpush3.bf16.msra.mxu1 %v1353_v8  ;;  %v386_v11 = vshrl.u32 %v32_v35, 7  ;;  %v1356_v35 = vld [vmem:[%s1805_s6] sm:$0xff]  }
  0xb6   :  { %649 = vmatprep.subr.bf16.mxu0 %v1291_v12  ;;  %1153 = vmatprep.subr.bf16.mxu1 %v1354_v9 }
  0xb7   :  { %v387_v12 = vsub.s32 0, %v386_v11 }
  0xb9   :  { %650 = vmatpush1.bf16.msra.mxu0 %v1289_v13  ;;  %1154 = vmatpush3.bf16.msra.mxu1 %v1355_v10  ;;  %v383_v13 = vld [vmem:[%s1802_s3] sm:$0x3] }
  0xba   :  { %651 = vmatprep.subr.bf16.mxu0 %v1294_v14  ;;  %1190 = vmatprep.subr.bf16.mxu1 %v1390_v5  ;;  %v391_v14 = vsub.s32 1, %v386_v11 }
  0xbd   :  { %652 = vmatpush1.bf16.msra.mxu0 %v1292_v15  ;;  %v388_v15 = vrot.slane %v383_v13, %v387_v12 }
  0xbe   :  { %653 = vmatprep.subr.bf16.mxu0 %v1297_v16  ;;  %v392_v16 = vrot.slane %v383_v13, %v391_v14 }
  0xc1   :  { %654 = vmatpush1.bf16.msra.mxu0 %v1295_v17 }
  0xc2   :  { %655 = vmatprep.subr.bf16.mxu0 %v1300_v18 }
  0xc5   :  { %656 = vmatpush1.bf16.msra.mxu0 %v1298_v19 }
  0xc6   :  { %657 = vmatprep.subr.bf16.mxu0 %v1303_v20 }
  0xc9   :  { %658 = vmatpush1.bf16.msra.mxu0 %v1301_v21 }
  0xca   :  { %659 = vmatprep.subr.bf16.mxu0 %v1306_v22 }
  0xcd   :  { %660 = vmatpush1.bf16.msra.mxu0 %v1304_v23 }
  0xce   :  { %661 = vmatprep.subr.bf16.mxu0 %v1309_v24 }
  0xd1   :  { %662 = vmatpush1.bf16.msra.mxu0 %v1307_v25 }
  0xd2   :  { %663 = vmatprep.subr.bf16.mxu0 %v1312_v26 }
  0xd5   :  { %664 = vmatpush1.bf16.msra.mxu0 %v1310_v27  ;;  %v1357_v27 = vld [vmem:[%s1805_s6 + $0x8] sm:$0xff]  }
  0xd6   :  { %665 = vmatprep.subr.bf16.mxu0 %v1315_v28  ;;  %v1358_v28 = vld [vmem:[%s1805_s6 + $0x10] sm:$0xff]  }
  0xd9   :  { %666 = vmatpush1.bf16.msra.mxu0 %v1313_v29  ;;  %v1359_v29 = vld [vmem:[%s1805_s6 + $0x18] sm:$0xff]  }
  0xda   :  { %676 = vmatprep.subr.bf16.mxu0 %v1318_v30  ;;  %v1360_v30 = vld [vmem:[%s1805_s6 + $0x20] sm:$0xff]   ;;  %s1016_s6 = sshll.u32 %s1398_s0, 4  ;;  %s1017_s6 = int_to_ptr.vmem [resolvable:$true] %s1016_s6 }
  0xdb   :  { %s1364_s5 = scalar_lea.vmem %s1017_s6, 128  ;;  %p1369_p1 = scmp.lt.s32.totalorder %s1017_s6, %s1017_s6 }
  0xdc   :  { %p1365_p0 = scmp.ne.s32.totalorder %s1017_s6, %s1364_s5  ;;  %p1370_p2 = scmp.lt.s32.totalorder %s1364_s5, %s1364_s5 }
  0xde   :  { %p1371_p3 = por %p1370_p2, %p1369_p1 }
  0xe0   :  { %p1372_p4 = pnand %p1371_p3, %p1365_p0 }
 0x16f   :  { %v285_v44 = vpop.f32.mrb[0].mxu0  ;;  %v326_v45 = vpop.f32.mrb[0].mxu1 }
 0x170   :  { %v287_v46 = vpop.f32.mrb[1].mxu0  ;;  %v1188_v47 = vpop.f32.mrb[1].mxu1  ;;  %v332_v52 = vpack.c.bf16 %v285_v44, %v285_v44  ;;  %v334_v6 = vpack.c.bf16 %v326_v45, %v326_v45 }
 0x171   :  { %v333_v48 = vpack.c.bf16 %v287_v46, %v287_v46  ;;  %v289_v49 = vpop.f32.mrb[2].mxu0  ;;  %v329_v50 = vpop.f32.mrb[2].mxu1 }
 0x172   :  { %v290_v53 = vpop.f32.mrb[3].mxu0  ;;  %v1189_v54 = vpop.f32.mrb[3].mxu1 }
 0x173   :  { %667 = vmatprep.mubr.bf16.mxu0 %v333_v48 }
 0x174   :  { %668 = vmatmul.mubr.bf16.vlgmr.msra.gmra.mrb[4].mxu0 %v332_v52 }
 0x175   :  { %677 = vmatpush1.bf16.msra.mxu0 %v1316_v51  ;;  %708 = vmatprep.mubr.bf16.mxu0 %v1389_v2  ;;  %v1325_v2 = vld [vmem:[%s1801_s2 + $0x130] ss:$8 sps:$4 sm:$0xff]  }
 0x176   :  { %678 = vmatprep.subr.bf16.mxu0 %v1321_v55 }
 0x179   :  { %679 = vmatpush1.bf16.msra.mxu0 %v1319_v56 }
 0x17a   :  { %680 = vmatprep.subr.bf16.mxu0 %v1324_v57 }
 0x17d   :  { %681 = vmatpush1.bf16.msra.mxu0 %v1322_v58 }
 0x17e   :  { %682 = vmatprep.subr.bf16.mxu0 %v1327_v59 }
 0x181   :  { %683 = vmatpush1.bf16.msra.mxu0 %v1325_v2 }
 0x182   :  { %684 = vmatprep.subr.bf16.mxu0 %v1330_v60 }
 0x185   :  { %685 = vmatpush1.bf16.msra.mxu0 %v1328_v61 }
 0x186   :  { %686 = vmatprep.subr.bf16.mxu0 %v1333_v62 }
 0x189   :  { %687 = vmatpush1.bf16.msra.mxu0 %v1331_v63 }
 0x18a   :  { %688 = vmatprep.subr.bf16.mxu0 %v1336_v0 }
 0x18d   :  { %689 = vmatpush1.bf16.msra.mxu0 %v1334_v1 }
 0x18e   :  { %690 = vmatprep.subr.bf16.mxu0 %v1339_v3 }
 0x191   :  { %691 = vmatpush1.bf16.msra.mxu0 %v1337_v4 }
 0x194   :  { %709 = vmatmul.mubr.bf16.vlgmr.msra.gmra.mrb[4].mxu0 %v334_v6 }
 0x267   :  { %v710_v17 = vpop.f32.mrb[4].mxu0 }
 0x268   :  { %v1210_v18 = vadd.f32 %v710_v17, %v388_v15  ;;  %v712_v19 = vpop.f32.mrb[5].mxu0 }
 0x269   :  { %v1211_v20 = vadd.f32 %v712_v19, %v392_v16  ;;  %v714_v21 = vpop.f32.mrb[6].mxu0 }
 0x26a   :  { %v717_v22 = vmax.f32 %v1210_v18, 0.0  ;;  %v715_v23 = vpop.f32.mrb[7].mxu0 }
 0x26b   :  { %v718_v24 = vmax.f32 %v1211_v20, 0.0 }
 0x26c   :  { %v719_v26 = vpack.c.bf16 %v717_v22, %v717_v22 }
 0x26d   :  { %v720_v25 = vpack.c.bf16 %v718_v24, %v718_v24 }
 0x26f   :  { %888 = vmatprep.mubr.bf16.mxu1 %v720_v25 }
 0x270   :  { %889 = vmatmul.mubr.bf16.vlgmr.msra.gmra.mrb[4].mxu1 %v719_v26 }
 0x271   :  { %1191 = vmatpush3.bf16.msra.mxu1 %v1356_v35  ;;  %1206 = vmatprep.mubr.msk.bf16.mxu1 %vm1397_vm0, %v1390_v5 }
 0x272   :  { %1192 = vmatprep.subr.bf16.mxu1 %v1390_v5 }
 0x275   :  { %1193 = vmatpush3.bf16.msra.mxu1 %v1357_v27 }
 0x276   :  { %1194 = vmatprep.subr.bf16.mxu1 %v1390_v5 }
 0x279   :  { %1195 = vmatpush3.bf16.msra.mxu1 %v1358_v28 }
 0x27a   :  { %1196 = vmatprep.subr.bf16.mxu1 %v1390_v5 }
 0x27d   :  { %1197 = vmatpush3.bf16.msra.mxu1 %v1359_v29 }
 0x27e   :  { %1198 = vmatprep.subr.bf16.mxu1 %v1390_v5 }
 0x281   :  { %1199 = vmatpush3.bf16.msra.mxu1 %v1360_v30 }
 0x282   :  { %1200 = vmatprep.subr.bf16.mxu1 %v1390_v5 }
 0x285   :  { %1201 = vmatpush3.bf16.msra.mxu1 %v1361_v31 }
 0x286   :  { %1202 = vmatprep.subr.bf16.mxu1 %v1390_v5 }
 0x289   :  { %1203 = vmatpush3.bf16.msra.mxu1 %v1362_v32 }
 0x28a   :  { %1204 = vmatprep.subr.bf16.mxu1 %v1390_v5  ;;  %v1121_v5 = vld [vmem:[%s1806_s7] ss:$0 sm:$0xff] }
 0x28d   :  { %1205 = vmatpush3.bf16.msra.mxu1 %v1363_v33 }
 0x343   :  { %v1155_v34 = vpop.f32.mrb[4].mxu1 }
 0x344   :  { %v1156_v37 = vpop.f32.mrb[5].mxu1 }
 0x345   :  { %v1157_v38 = vadd.f32 %v1156_v37, %v1155_v34  ;;  %v1158_v39 = vpop.f32.mrb[6].mxu1 }
 0x346   :  { %v1159_v40 = vpop.f32.mrb[7].mxu1 }
 0x347   :  { %v891_v41 = vadd.f32 %v1157_v38, %v1104_v36 }
 0x349   :  { %v896_v42 = vmax.f32 %v891_v41, 0.0 }
 0x34b   :  { %v897_v43 = vpack.c.bf16 %v896_v42, %v896_v42 }
 0x34d   :  { %1207 = vmatmul.mubr.bf16.vlgmr.msra.gmra.mrb[8].mxu1 %v897_v43 }
 0x420   :  { %v1003_v44 = vpop.f32.mrb[8].mxu1 }
 0x421   :  { %v1004_v45 = vadd.f32 %v1121_v5, %v1003_v44  ;;  %v1208_v46 = vpop.f32.mrb[9].mxu1 }
 0x422   :  { %v1006_v47 = vpop.f32.mrb[10].mxu1 }
 0x423   :  { %1009 = vst [vmem:[#allocation2] sm:$0xff] %v1004_v45  ;;  %v1209_v48 = vpop.f32.mrb[11].mxu1 }
 0x424   :  { %1375 = shalt.err (!%p1372_p4)
}
 0x425   :  { %s1376_s7 = scalar_lea.hbm %s1807_s8, 128 }
 0x426   :  { %p1377_p5 = scmp.ne.s32.totalorder %s1807_s8, %s1376_s7  ;;  %p1380_p6 = scmp.lt.u32.totalorder %s1376_s7, %s1807_s8 }
 0x428   :  { %p1382_p7 = pnand %p1380_p6, %p1377_p5 }
 0x42a   :  { %1385 = shalt.err (!%p1382_p7)
}
 0x42b   :  { %1019 = dma.vmem_to_hbm [thread:$0]  %s1017_s6, 128, %s1807_s8, [#allocation3]  }
 0x42c   :  { %1386 = dma.done.wait [#allocation3], 128  }
 0x42d   :  { %1387 = vsyncadd [#allocation3], 4294967168 }
 0x42e   :  { %1023 = vsyncpa [#allocation3], 1 }

</bundles_post_ra>
